<compile_context>
chip_gen: v6e
topology: v6e:2x2x1
jax: 0.10.0
libtpu: 0.0.40
codegen_flags: <defaults>
</compile_context>

<pallas_src>
import functools

import jax
import jax.numpy as jnp
from jax.experimental import pallas as pl
from jax.experimental.pallas import tpu as pltpu


def _round_up(x, m):
    return ((x + m - 1) // m) * m


def _patch_embed_kernel(x_ref, w_ref, p_ref, o_ref):
    # x_ref: (1, K, TS)  patch columns for one (batch, S-tile) grid point
    # w_ref: (E, K)      conv weight (constant across grid -> DMA'd once)
    # p_ref: (E, 3)      merged [conv_bias | ln_gamma | ln_beta], f32
    # o_ref: (1, E, TS)  output block, written lane-dense
    x = x_ref[0]                                              # (K, TS)
    w = w_ref[...]                                            # (E, K)
    # MXU matmul, f32 accumulation (inputs may be f32 or bf16).
    y = jnp.dot(w, x, preferred_element_type=jnp.float32)     # (E, TS) f32
    p = p_ref[...].astype(jnp.float32)
    y = y + p[:, 0:1]                                         # conv bias
    # LayerNorm over the embedding (sublane) axis, f32 statistics.
    mean = jnp.mean(y, axis=0, keepdims=True)                 # (1, TS)
    c = y - mean
    var = jnp.mean(c * c, axis=0, keepdims=True)
    y = c * jax.lax.rsqrt(var + 1e-5)
    y = y * p[:, 1:2] + p[:, 2:3]                             # gamma / beta
    o_ref[0] = y.astype(o_ref.dtype)


@functools.partial(jax.jit, static_argnames=("patch_size", "compute_dtype"))
def split_backbone_forward(x, conv_w, conv_b, ln_g, ln_b, *,
                           patch_size=(2, 4, 4), compute_dtype=jnp.float32):
    """x: [B, C, T, H, W].  Returns [B, E, T', H', W'] in x.dtype."""
    B, C, T, H, W = x.shape
    pt, ph, pw = patch_size
    E = conv_w.shape[0]
    Tp, Hp, Wp = T // pt, H // ph, W // pw
    K = C * pt * ph * pw
    S = Tp * Hp * Wp                      # patches per batch element

    # Lane tile over patches.  Pad S so the last tile is full (no remainder
    # is dropped); TS is a multiple of 128 -> lane-dense loads and stores.
    TS = min(1024, _round_up(S, 128))     # sweepable (512-2048 all fine)
    S_pad = _round_up(S, TS)

    # --- glue: patch slab (B, K, S), columns ordered (c, kt, kh, kw) to match
    # Conv3d weight flattening; S ordered (t', h', w') to match the output.
    # This is the only HBM reorganization; allow_input_fusion lets XLA fuse
    # this producer into the pallas_call input DMA instead of materializing.
    xt = x.reshape(B, C, Tp, pt, Hp, ph, Wp, pw)
    xt = jnp.transpose(xt, (0, 1, 3, 5, 7, 2, 4, 6))   # (B, C, pt, ph, pw, Tp, Hp, Wp)
    xt = xt.reshape(B, K, S)
    if S_pad != S:
        xt = jnp.pad(xt, ((0, 0), (0, 0), (0, S_pad - S)))
    xt = xt.astype(compute_dtype)

    w2d = conv_w.reshape(E, K).astype(compute_dtype)                     # (E, K)
    params = jnp.stack([conv_b, ln_g, ln_b], axis=-1).astype(jnp.float32)  # (E, 3)

    out_dtype = x.dtype
    grid = (B, pl.cdiv(S_pad, TS))

    out = pl.pallas_call(
        _patch_embed_kernel,
        out_shape=jax.ShapeDtypeStruct((B, E, S_pad), out_dtype),
        grid_spec=pltpu.PrefetchScalarGridSpec(
            num_scalar_prefetch=0,
            grid=grid,
            in_specs=[
                pl.BlockSpec((1, K, TS), lambda b, i: (b, 0, i)),
                pl.BlockSpec((E, K), lambda b, i: (0, 0)),
                pl.BlockSpec((E, 3), lambda b, i: (0, 0)),
            ],
            out_specs=pl.BlockSpec((1, E, TS), lambda b, i: (b, 0, i)),
        ),
        compiler_params=pltpu.CompilerParams(
            dimension_semantics=("parallel", "parallel"),
            allow_input_fusion=[True, False, False],
            vmem_limit_bytes=32 * 1024 * 1024,
        ),
    )(xt, w2d, params)

    # Output is already channels-second; drop S padding and split spatial dims
    # (free row-major reshape, no transpose pass needed).
    out = out[:, :, :S].reshape(B, E, Tp, Hp, Wp)
    return out


def _reference(x, conv_w, conv_b, ln_g, ln_b, patch_size=(2, 4, 4)):
    """Pure-JAX reference of the same synthetic backbone (for sanity check)."""
    B, C, T, H, W = x.shape
    pt, ph, pw = patch_size
    E = conv_w.shape[0]
    Tp, Hp, Wp = T // pt, H // ph, W // pw
    xp = x.reshape(B, C, Tp, pt, Hp, ph, Wp, pw)
    xp = jnp.transpose(xp, (0, 2, 4, 6, 1, 3, 5, 7)).reshape(-1, C * pt * ph * pw)
    y = xp @ conv_w.reshape(E, -1).T + conv_b
    mean = y.mean(-1, keepdims=True)
    var = ((y - mean) ** 2).mean(-1, keepdims=True)
    y = (y - mean) / jnp.sqrt(var + 1e-5) * ln_g + ln_b
    y = y.reshape(B, Tp, Hp, Wp, E)
    return jnp.transpose(y, (0, 4, 1, 2, 3))


if __name__ == "__main__":
    # Small shapes consistent with a video backbone input: [B, C, T, H, W]
    B, C, T, H, W = 2, 3, 4, 16, 16
    PATCH = (2, 4, 4)
    EMBED = 32

    key = jax.random.PRNGKey(0)
    kx, kw, kb, kg, kbe = jax.random.split(key, 5)

    x = jax.random.normal(kx, (B, C, T, H, W), dtype=jnp.float32)
    # Deterministic synthetic parameters (Conv3d weight layout [E, C, pt, ph, pw])
    conv_w = 0.05 * jax.random.normal(kw, (EMBED, C, *PATCH), dtype=jnp.float32)
    conv_b = 0.01 * jax.random.normal(kb, (EMBED,), dtype=jnp.float32)
    ln_g = jnp.ones((EMBED,), jnp.float32) + 0.1 * jax.random.normal(kg, (EMBED,))
    ln_b = 0.1 * jax.random.normal(kbe, (EMBED,), dtype=jnp.float32)

    ref = _reference(x, conv_w, conv_b, ln_g, ln_b, PATCH)

    # f32 path: must match the reference tightly.
    out = split_backbone_forward(x, conv_w, conv_b, ln_g, ln_b, patch_size=PATCH)
    out = jax.block_until_ready(out)
    assert out.shape == (B, EMBED, T // PATCH[0], H // PATCH[1], W // PATCH[2])
    assert jnp.allclose(out, ref, atol=1e-4, rtol=1e-4), "f32 mismatch vs reference"

    # bf16 input path (v6e/v7x bandwidth optimization): f32 accumulation + f32
    # LayerNorm statistics, so only input-rounding error remains.
    out_bf16 = split_backbone_forward(x, conv_w, conv_b, ln_g, ln_b,
                                      patch_size=PATCH,
                                      compute_dtype=jnp.bfloat16)
    out_bf16 = jax.block_until_ready(out_bf16)
    assert jnp.allclose(out_bf16, ref, atol=1e-1, rtol=1e-1), "bf16 mismatch vs reference"

    print("KERNEL_OK")
</pallas_src>

<mosaic_0001>
module attributes {stable_mosaic.version = 11 : i64} {
  func.func @_patch_embed_kernel(%arg0: i32, %arg1: i32, %arg2: memref<1x96x128xf32, #tpu.memory_space<vmem>>, %arg3: memref<32x96xf32, #tpu.memory_space<vmem>>, %arg4: memref<32x3xf32, #tpu.memory_space<vmem>>, %arg5: memref<1x32x128xf32, #tpu.memory_space<vmem>>) attributes {dimension_semantics = [#tpu.dimension_semantics<parallel>, #tpu.dimension_semantics<parallel>], iteration_bounds = array<i64: 2, 1>, scalar_prefetch = 0 : i64, scratch_operands = 0 : i64, tpu.core_type = #tpu.core_type<tc>, window_params = [{transform_indices = @transform_0, window_bounds = array<i64: 1, 96, 128>}, {pipeline_mode = #tpu.pipeline_mode<synchronous>, transform_indices = @transform_1, window_bounds = array<i64: 32, 96>}, {pipeline_mode = #tpu.pipeline_mode<synchronous>, transform_indices = @transform_2, window_bounds = array<i64: 32, 3>}, {transform_indices = @transform_3, window_bounds = array<i64: 1, 32, 128>}]} {
    %c0 = arith.constant 0 : index
    %c0_0 = arith.constant 0 : index
    %c0_1 = arith.constant 0 : index
    %0 = vector.load %arg2[%c0, %c0_0, %c0_1] : memref<1x96x128xf32, #tpu.memory_space<vmem>>, vector<1x96x128xf32>
    %1 = vector.shape_cast %0 : vector<1x96x128xf32> to vector<96x128xf32>
    %c0_2 = arith.constant 0 : index
    %c0_3 = arith.constant 0 : index
    %2 = vector.load %arg3[%c0_2, %c0_3] : memref<32x96xf32, #tpu.memory_space<vmem>>, vector<32x96xf32>
    %cst = arith.constant dense<0.000000e+00> : vector<32x128xf32>
    %3 = tpu.matmul %2, %1, %cst {dimension_numbers = #tpu.dot_dimension_numbers<[1], [0], [0], [1], [0, 0, 1, 1], [], []>} : vector<32x96xf32>, vector<96x128xf32>, vector<32x128xf32> -> vector<32x128xf32>
    %c0_4 = arith.constant 0 : index
    %c0_5 = arith.constant 0 : index
    %4 = vector.load %arg4[%c0_4, %c0_5] : memref<32x3xf32, #tpu.memory_space<vmem>>, vector<32x3xf32>
    %5 = vector.extract_strided_slice %4 {offsets = [0, 0], sizes = [32, 1], strides = [1, 1]} : vector<32x3xf32> to vector<32x1xf32>
    %6 = vector.broadcast %5 : vector<32x1xf32> to vector<32x128xf32>
    %7 = arith.addf %3, %6 : vector<32x128xf32>
    %cst_6 = arith.constant dense<0.000000e+00> : vector<128xf32>
    %8 = vector.multi_reduction <add>, %7, %cst_6 [0] : vector<32x128xf32> to vector<128xf32>
    %9 = vector.shape_cast %8 : vector<128xf32> to vector<1x128xf32>
    %cst_7 = arith.constant 3.200000e+01 : f32
    %10 = vector.broadcast %cst_7 : f32 to vector<1x128xf32>
    %11 = arith.divf %9, %10 : vector<1x128xf32>
    %12 = vector.broadcast %11 : vector<1x128xf32> to vector<32x128xf32>
    %13 = arith.subf %7, %12 : vector<32x128xf32>
    %14 = arith.mulf %13, %13 : vector<32x128xf32>
    %cst_8 = arith.constant dense<0.000000e+00> : vector<128xf32>
    %15 = vector.multi_reduction <add>, %14, %cst_8 [0] : vector<32x128xf32> to vector<128xf32>
    %16 = vector.shape_cast %15 : vector<128xf32> to vector<1x128xf32>
    %cst_9 = arith.constant 3.200000e+01 : f32
    %17 = vector.broadcast %cst_9 : f32 to vector<1x128xf32>
    %18 = arith.divf %16, %17 : vector<1x128xf32>
    %cst_10 = arith.constant 9.99999974E-6 : f32
    %19 = vector.broadcast %cst_10 : f32 to vector<1x128xf32>
    %20 = arith.addf %18, %19 : vector<1x128xf32>
    %21 = math.rsqrt %20 : vector<1x128xf32>
    %22 = vector.broadcast %21 : vector<1x128xf32> to vector<32x128xf32>
    %23 = arith.mulf %13, %22 : vector<32x128xf32>
    %24 = vector.extract_strided_slice %4 {offsets = [0, 1], sizes = [32, 1], strides = [1, 1]} : vector<32x3xf32> to vector<32x1xf32>
    %25 = vector.broadcast %24 : vector<32x1xf32> to vector<32x128xf32>
    %26 = arith.mulf %23, %25 : vector<32x128xf32>
    %27 = vector.extract_strided_slice %4 {offsets = [0, 2], sizes = [32, 1], strides = [1, 1]} : vector<32x3xf32> to vector<32x1xf32>
    %28 = vector.broadcast %27 : vector<32x1xf32> to vector<32x128xf32>
    %29 = arith.addf %26, %28 : vector<32x128xf32>
    %c0_11 = arith.constant 0 : index
    %c0_12 = arith.constant 0 : index
    %c0_13 = arith.constant 0 : index
    %30 = vector.load %arg5[%c0_11, %c0_12, %c0_13] : memref<1x32x128xf32, #tpu.memory_space<vmem>>, vector<1x32x128xf32>
    %31 = vector.shape_cast %30 : vector<1x32x128xf32> to vector<32x128xf32>
    %32 = vector.shape_cast %29 : vector<32x128xf32> to vector<1x32x128xf32>
    tpu.vector_store %arg5[%c0_11, %c0_12, %c0_13], %32 {strides = array<i32>} : memref<1x32x128xf32, #tpu.memory_space<vmem>>, vector<1x32x128xf32>,
    return
  }
  func.func @transform_0(%arg0: i32, %arg1: i32) -> (i32, i32, i32) {
    %c0_i32 = arith.constant 0 : i32
    %c0_i32_0 = arith.constant 0 : i32
    return %arg0, %c0_i32, %arg1 : i32, i32, i32
  }
  func.func @transform_1(%arg0: i32, %arg1: i32) -> (i32, i32) {
    %c0_i32 = arith.constant 0 : i32
    %c0_i32_0 = arith.constant 0 : i32
    %c0_i32_1 = arith.constant 0 : i32
    return %c0_i32, %c0_i32_0 : i32, i32
  }
  func.func @transform_2(%arg0: i32, %arg1: i32) -> (i32, i32) {
    %c0_i32 = arith.constant 0 : i32
    %c0_i32_0 = arith.constant 0 : i32
    %c0_i32_1 = arith.constant 0 : i32
    return %c0_i32, %c0_i32_0 : i32, i32
  }
  func.func @transform_3(%arg0: i32, %arg1: i32) -> (i32, i32, i32) {
    %c0_i32 = arith.constant 0 : i32
    %c0_i32_0 = arith.constant 0 : i32
    return %arg0, %c0_i32, %arg1 : i32, i32, i32
  }
}

</mosaic_0001>

<bundles_post_ra>
// kernel: split_backbone_forward.2
= control target key start
LH: loop header
LB: loop body
LE: loop exit
PB: predicated region body
PF: predicated region fallthrough
CT: control target
= control target key end

     0   :  { %s941_s17 = smov 0   ;;  %s943_s18 = smov 0   ;;  %s1079_s0 = inlined_call_operand.vmem [shape: f32[32,96], index: 0, kind: input, shape index: {}]   ;;  %s1080_s1 = inlined_call_operand.vmem [shape: f32[32,3], index: 1, kind: input, shape index: {}]   ;;  %s1081_s2 = inlined_call_operand.vmem [shape: f32[2,96,32], index: 2, kind: input, shape index: {}]   ;;  %s1082_s3 = inlined_call_operand.<no memory space> [shape: f32[], index: 3, kind: input, shape index: {}]   ;;  %s1083_s4 = inlined_call_operand.vmem [shape: f32[2,32,128], index: 4, kind: output, shape index: {}]  }
   0x1   :  { %v939_v0 = vstv %s1082_s3  ;;  %s945_s19 = smov 0  }
   0x2 LB: > { %s27_s3 = sadd.s32 1, %s902_s18  ;;  %p756_p0 = scmp.ge.s32.totalorder %s906_s19, 1  ;;  %s906_s19 = sphi %s945_s19, %s15_s19   ;;  %s902_s18 = sphi %s943_s18, %s1085_s18   ;;  %s898_s17 = sphi %s941_s17, %s1084_s17  }
   0x3   : > { %p29_p1 = scmp.ge.s32.totalorder %s27_s3, 2  ;;  %p162_p2 = scmp.lt.s32.totalorder %s906_s19, 3 }
   0x5   : > { %s1087_s3 = smov (%p29_p1, %s27_s3), 0  ;;  %p163_p3 = pnand %p756_p0, %p162_p2 }
   0x6   : > { %p196_p4 = scmp.lt.s32.totalorder (!%p163_p3), %s898_s17, 1 }
   0x7   : > { %166 = sbr.rel (%p163_p3) target bundleno = 308 (0x134), region = 32 }
   0xc   : > { %v223_v1 = vlaneseq  ;;  %v464_v2 = vld [vmem:[%s1079_s0] sm:$0xff]  ;;  %vm492_vm0 = vcmask 785408   ;;  %v466_v3 = vld [vmem:[%s1079_s0 + $0x10] sm:$0xff]  ;;  %s1089_s17 = smov (!%p196_p4, %s898_s17), 1  ;;  %v908_v7 = vmov 0   ;;  %v987_v8 = vld [vmem:[%s1080_s1 + $0x8] sm:$0xff] }
   0xd   : > { %818 = vmatprep.mubr.msk.f32.mxu0 %vm492_vm0, %v464_v2  ;;  %821 = vmatprep.mubr.msk.f32.mxu1 %vm492_vm0, %v466_v3  ;;  %v970_v4 = vld [vmem:[%s1080_s1] sm:$0xff]  ;;  %v975_v5 = vld [vmem:[%s1080_s1 + $0x10] sm:$0xff]  ;;  %s848_s28 = smul.u32 96, %s1089_s17  ;;  %v992_v9 = vld [vmem:[%s1080_s1 + $0x18] sm:$0xff]  ;;  %v909_v36 = vmov 1   ;;  %v910_v37 = vmov 2  }
   0xe   : > { %v979_v6 = vand.u32 127, %v223_v1  ;;  %876 = vset.pattern.permute.xlu0 %v908_v7  ;;  %877 = vset.pattern.permute.xlu1 %v908_v7  ;;  %v465_v34 = vld [vmem:[%s1079_s0 + $0x8] sm:$0xff]  ;;  %v467_v35 = vld [vmem:[%s1079_s0 + $0x18] sm:$0xff]  ;;  %s777_s14 = sshll.u32 %s1089_s17, 5 }
   0xf   : > { %474 = vperm.xlu0 %876, %v970_v4   ;;  %484 = vperm.xlu1 %877, %v975_v5   ;;  %s998_s9 = scalar_lea.vmem %s1081_s2, %s848_s28  ;;  %s213_s20 = scalar_lea.vmem %s1083_s4, %s777_s14 }
  0x10   : > { %vm227_vm1 = vcmp.lt.s32.totalorder %v979_v6, 32  ;;  %v770_v10 = vld [vmem:[%s998_s9 + $0x58] sm:$0xff]  ;;  %v769_v11 = vld [vmem:[%s998_s9 + $0x50] sm:$0xff]  ;;  %v768_v12 = vld [vmem:[%s998_s9 + $0x48] sm:$0xff] }
  0x11   : > { %v447_v13 = vsel %vm227_vm1, %v770_v10, %v939_v0  ;;  %v427_v14 = vsel %vm227_vm1, %v769_v11, %v939_v0  ;;  %v767_v15 = vld [vmem:[%s998_s9 + $0x40] sm:$0xff]  ;;  %v407_v16 = vsel %vm227_vm1, %v768_v12, %v939_v0  ;;  %v766_v17 = vld [vmem:[%s998_s9 + $0x38] sm:$0xff]  ;;  %v765_v19 = vld [vmem:[%s998_s9 + $0x30] sm:$0xff] }
  0x12   : > { %794 = vmatprep.subr.mxu0 %v447_v13  ;;  %824 = vmatprep.subr.mxu1 %v447_v13  ;;  %v387_v18 = vsel %vm227_vm1, %v767_v15, %v939_v0  ;;  %v367_v20 = vsel %vm227_vm1, %v766_v17, %v939_v0  ;;  %v764_v21 = vld [vmem:[%s998_s9 + $0x28] sm:$0xff]  ;;  %v347_v22 = vsel %vm227_vm1, %v765_v19, %v939_v0  ;;  %v763_v23 = vld [vmem:[%s998_s9 + $0x20] sm:$0xff]  ;;  %v762_v25 = vld [vmem:[%s998_s9 + $0x18] sm:$0xff] }
  0x13   : > { %479 = vperm.xlu0 %876, %v987_v8   ;;  %489 = vperm.xlu1 %877, %v992_v9   ;;  %v327_v24 = vsel %vm227_vm1, %v764_v21, %v939_v0  ;;  %v307_v26 = vsel %vm227_vm1, %v763_v23, %v939_v0  ;;  %v761_v27 = vld [vmem:[%s998_s9 + $0x10] sm:$0xff]  ;;  %v287_v28 = vsel %vm227_vm1, %v762_v25, %v939_v0  ;;  %v760_v29 = vld [vmem:[%s998_s9 + $0x8] sm:$0xff]  ;;  %v217_v31 = vld [vmem:[%s998_s9] sm:$0xff] }
  0x14   : > { %795 = vmatpush3.msra.mxu0 %v447_v13  ;;  %836 = vmatpush3.msra.mxu1 %v447_v13  ;;  %v267_v30 = vsel %vm227_vm1, %v761_v27, %v939_v0  ;;  %v247_v32 = vsel %vm227_vm1, %v760_v29, %v939_v0  ;;  %v228_v33 = vsel %vm227_vm1, %v217_v31, %v939_v0 }
  0x15   : > { %796 = vmatprep.subr.mxu0 %v427_v14  ;;  %825 = vmatprep.subr.mxu1 %v427_v14 }
  0x16   : > { %797 = vmatpush3.msra.mxu0 %v427_v14  ;;  %837 = vmatpush3.msra.mxu1 %v427_v14 }
  0x17   : > { %798 = vmatprep.subr.mxu0 %v407_v16  ;;  %826 = vmatprep.subr.mxu1 %v407_v16 }
  0x18   : > { %799 = vmatpush3.msra.mxu0 %v407_v16  ;;  %838 = vmatpush3.msra.mxu1 %v407_v16 }
  0x19   : > { %800 = vmatprep.subr.mxu0 %v387_v18  ;;  %827 = vmatprep.subr.mxu1 %v387_v18 }
  0x1a   : > { %801 = vmatpush3.msra.mxu0 %v387_v18  ;;  %839 = vmatpush3.msra.mxu1 %v387_v18 }
  0x1b   : > { %802 = vmatprep.subr.mxu0 %v367_v20  ;;  %828 = vmatprep.subr.mxu1 %v367_v20 }
  0x1c   : > { %803 = vmatpush3.msra.mxu0 %v367_v20  ;;  %840 = vmatpush3.msra.mxu1 %v367_v20 }
  0x1d   : > { %804 = vmatprep.subr.mxu0 %v347_v22  ;;  %829 = vmatprep.subr.mxu1 %v347_v22 }
  0x1e   : > { %805 = vmatpush3.msra.mxu0 %v347_v22  ;;  %841 = vmatpush3.msra.mxu1 %v347_v22 }
  0x1f   : > { %806 = vmatprep.subr.mxu0 %v327_v24  ;;  %830 = vmatprep.subr.mxu1 %v327_v24 }
  0x20   : > { %807 = vmatpush3.msra.mxu0 %v327_v24  ;;  %842 = vmatpush3.msra.mxu1 %v327_v24 }
  0x21   : > { %808 = vmatprep.subr.mxu0 %v307_v26  ;;  %831 = vmatprep.subr.mxu1 %v307_v26 }
  0x22   : > { %809 = vmatpush3.msra.mxu0 %v307_v26  ;;  %843 = vmatpush3.msra.mxu1 %v307_v26 }
  0x23   : > { %810 = vmatprep.subr.mxu0 %v287_v28  ;;  %832 = vmatprep.subr.mxu1 %v287_v28 }
  0x24   : > { %811 = vmatpush3.msra.mxu0 %v287_v28  ;;  %844 = vmatpush3.msra.mxu1 %v287_v28 }
  0x25   : > { %812 = vmatprep.subr.mxu0 %v267_v30  ;;  %833 = vmatprep.subr.mxu1 %v267_v30 }
  0x26   : > { %813 = vmatpush3.msra.mxu0 %v267_v30  ;;  %845 = vmatpush3.msra.mxu1 %v267_v30 }
  0x27   : > { %814 = vmatprep.subr.mxu0 %v247_v32  ;;  %834 = vmatprep.subr.mxu1 %v247_v32 }
  0x28   : > { %815 = vmatpush3.msra.mxu0 %v247_v32  ;;  %846 = vmatpush3.msra.mxu1 %v247_v32 }
  0x29   : > { %816 = vmatprep.subr.mxu0 %v228_v33  ;;  %835 = vmatprep.subr.mxu1 %v228_v33 }
  0x2a   : > { %817 = vmatpush3.msra.mxu0 %v228_v33  ;;  %847 = vmatpush3.msra.mxu1 %v228_v33 }
  0x2b   : > { %819 = vmatmul.mubr.msk.f32.vlgmr.msra.gmra.mxu0 %vm492_vm0, %v465_v34  ;;  %822 = vmatmul.mubr.msk.f32.vlgmr.msra.gmra.mxu1 %vm492_vm0, %v467_v35 }
  0x2c   : > { %879 = vset.pattern.permute.xlu1 %v909_v36  ;;  %878 = vset.pattern.permute.xlu0 %v909_v36 }
  0x2d   : > { %630 = vperm.xlu1 %879, %v987_v8   ;;  %626 = vperm.xlu0 %878, %v970_v4  }
  0x31   : > { %634 = vperm.xlu1 %879, %v975_v5   ;;  %638 = vperm.xlu0 %878, %v992_v9  }
  0x35   : > { %880 = vset.pattern.permute.xlu1 %v910_v37  ;;  %881 = vset.pattern.permute.xlu0 %v910_v37 }
  0x36   : > { %646 = vperm.xlu1 %880, %v970_v4   ;;  %650 = vperm.xlu0 %881, %v987_v8  }
  0x3a   : > { %654 = vperm.xlu1 %880, %v975_v5  }
  0x3e   : > { %658 = vperm.xlu1 %880, %v992_v9  }
  0x8a   : > { %v475_v38 = vpop.permute.xlu0 %474  ;;  %v485_v39 = vpop.permute.xlu1 %484 }
  0x8e   : > { %v480_v42 = vpop.permute.xlu0 %479  ;;  %v490_v47 = vpop.permute.xlu1 %489 }
  0xa8   : > { %v631_v13 = vpop.permute.xlu1 %630  ;;  %v627_v19 = vpop.permute.xlu0 %626 }
  0xac   : > { %v635_v17 = vpop.permute.xlu1 %634  ;;  %v639_v21 = vpop.permute.xlu0 %638 }
  0xb1   : > { %v647_v18 = vpop.permute.xlu1 %646  ;;  %v651_v27 = vpop.permute.xlu0 %650 }
  0xb5   : > { %v655_v20 = vpop.permute.xlu1 %654 }
  0xb9   : > { %v659_v32 = vpop.permute.xlu1 %658 }
  0xeb   : > { %v820_v40 = vpop.f32.mrf.mxu0  ;;  %v823_v41 = vpop.f32.mrf.mxu1 }
  0xec   : > { %v577_v45 = vadd.f32 %v820_v40, %v480_v42  ;;  %v587_v50 = vadd.f32 %v823_v41, %v490_v47 }
  0xed   : > { %v571_v43 = vpop.f32.mrf.mxu0  ;;  %v581_v44 = vpop.f32.mrf.mxu1 }
  0xee   : > { %v572_v46 = vadd.f32 %v571_v43, %v475_v38  ;;  %v582_v49 = vadd.f32 %v581_v44, %v485_v39 }
  0xf0   : > { %v590_v48 = vadd.f32 %v577_v45, %v572_v46 }
  0xf2   : > { %v591_v51 = vadd.f32 %v590_v48, %v582_v49 }
  0xf4   : > { %v592_v52 = vadd.f32 %v591_v51, %v587_v50 }
  0xf6   : > { %v593_v53 = vrot.slane %v592_v52, 4 }
  0xf8   : > { %v594_v54 = vadd.f32 %v593_v53, %v592_v52 }
  0xfa   : > { %v595_v55 = vrot.slane %v594_v54, 2 }
  0xfc   : > { %v596_v56 = vadd.f32 %v595_v55, %v594_v54 }
  0xfe   : > { %v597_v57 = vrot.slane %v596_v56, 1 }
 0x100   : > { %v598_v58 = vadd.f32 %v597_v57, %v596_v56 }
 0x102   : > { %v600_v59 = vmul.f32 0.03125, %v598_v58 }
 0x104   : > { %v603_v60 = vsub.f32 %v582_v49, %v600_v59  ;;  %v601_v61 = vsub.f32 %v572_v46, %v600_v59  ;;  %v602_v62 = vsub.f32 %v577_v45, %v600_v59  ;;  %v604_v63 = vsub.f32 %v587_v50, %v600_v59 }
 0x106   : > { %v605_v1 = vmul.f32 %v601_v61, %v601_v61  ;;  %v606_v2 = vmul.f32 %v602_v62, %v602_v62  ;;  %v607_v3 = vmul.f32 %v603_v60, %v603_v60  ;;  %v608_v5 = vmul.f32 %v604_v63, %v604_v63 }
 0x108   : > { %v609_v4 = vadd.f32 %v606_v2, %v605_v1 }
 0x10a   : > { %v610_v6 = vadd.f32 %v609_v4, %v607_v3 }
 0x10c   : > { %v611_v7 = vadd.f32 %v610_v6, %v608_v5 }
 0x10e   : > { %v612_v8 = vrot.slane %v611_v7, 4 }
 0x110   : > { %v613_v9 = vadd.f32 %v612_v8, %v611_v7 }
 0x112   : > { %v614_v10 = vrot.slane %v613_v9, 2 }
 0x114   : > { %v615_v11 = vadd.f32 %v614_v10, %v613_v9 }
 0x116   : > { %v616_v12 = vrot.slane %v615_v11, 1 }
 0x118   : > { %v617_v14 = vadd.f32 %v616_v12, %v615_v11 }
 0x11a   : > { %v618_v15 = vmul.f32 0.03125, %v617_v14 }
 0x11c   : > { %v619_v16 = vadd.f32 1e-05, %v618_v15 }
 0x11e   : > { %882 = vrsqrt.f32 %v619_v16 }
 0x12b   : > { %v883_v22 = vpop.eup %882 }
 0x12c   : > { %v622_v23 = vmul.f32 %v883_v22, %v602_v62  ;;  %v623_v24 = vmul.f32 %v883_v22, %v603_v60  ;;  %v621_v25 = vmul.f32 %v883_v22, %v601_v61  ;;  %v624_v26 = vmul.f32 %v883_v22, %v604_v63 }
 0x12e   : > { %v642_v28 = vmul.f32 %v631_v13, %v622_v23  ;;  %v643_v29 = vmul.f32 %v635_v17, %v623_v24  ;;  %v641_v30 = vmul.f32 %v627_v19, %v621_v25  ;;  %v644_v31 = vmul.f32 %v639_v21, %v624_v26 }
 0x130   : > { %v661_v33 = vadd.f32 %v647_v18, %v641_v30  ;;  %v663_v34 = vadd.f32 %v655_v20, %v643_v29  ;;  %v664_v35 = vadd.f32 %v659_v32, %v644_v31  ;;  %v662_v36 = vadd.f32 %v651_v27, %v642_v28 }
 0x132   : > { %665 = vst [vmem:[%s213_s20] sm:$0xff] %v661_v33  ;;  %667 = vst [vmem:[%s213_s20 + $0x10] sm:$0xff] %v663_v34 }
 0x133   : > { %668 = vst [vmem:[%s213_s20 + $0x18] sm:$0xff] %v664_v35  ;;  %666 = vst [vmem:[%s213_s20 + $0x8] sm:$0xff] %v662_v36 }
 0x134 PF: > { %s15_s19 = sadd.s32 1, %s906_s19   ;;  %s1084_s17 = smov %s902_s18 }
 0x135   : > { %p12_p5 = scmp.ge.s32.totalorder %s15_s19, 4   ;;  %s1085_s18 = smov %s1087_s3 }
 0x137   :  { %14 = sbr.rel (!%p12_p5) target bundleno = 2 (0x2), region = 84 }

</bundles_post_ra>
